<compile_context>
chip_gen: v7x
topology: tpu7x:2x2x1
jax: 0.10.0
libtpu: 0.0.40
codegen_flags: <defaults>
</compile_context>

<pallas_src>
import functools

import jax
import jax.numpy as jnp
from jax.experimental import pallas as pl
from jax.experimental.pallas import tpu as pltpu


def _round_up(x, m):
    return ((x + m - 1) // m) * m


def _device_kind():
    try:
        return jax.devices()[0].device_kind.lower()
    except Exception:  # pragma: no cover - no device / interpret fallback
        return ""


def _gem_kernel(p_ref, x_ref, o_ref, *, eps, hw, compute_dtype):
    """One (TM, H*W) row-tile of the GeM reduction.

    p_ref: SMEM (1,) float32 -- trainable exponent p (resident in SMEM).
    x_ref: VMEM (TM, H*W) tile of the flattened input.
    o_ref: VMEM (TM, 1) pooled output column for this tile.
    """
    p = p_ref[0]                                     # f32 scalar from SMEM
    inv_p = 1.0 / p                                  # one scalar divide per tile

    x = x_ref[...]
    if x.dtype != compute_dtype:
        x = x.astype(compute_dtype)
    x = jnp.maximum(x, jnp.asarray(eps, compute_dtype))        # clamp(min=eps) -> x > 0
    p_c = p.astype(compute_dtype)
    xp = jnp.exp(p_c * jnp.log(x))                   # x ** p on the EUP (bf16-packed on v6e/v7x)

    # mean over the spatial axis: f32 accumulation, Python-constant reciprocal
    m = jnp.sum(xp.astype(jnp.float32), axis=-1, keepdims=True) * (1.0 / hw)
    o_ref[...] = jnp.exp(jnp.log(m) * inv_p).astype(o_ref.dtype)   # m ** (1/p), f32 math


def _pick_row_tile(rows, hw_lanes, itemsize, per_buffer_bytes):
    """Row-tile size TM.

    * sized to fill ~per_buffer_bytes of VMEM using the *lane-padded* input width
      plus the lane-padded (TM, 1) output tile,
    * clamped so the row grid keeps >= ~8 tiles (megacore sharding on v7x),
    * snapped to an exact divisor of `rows` when one lies in [TM/2, TM] so the
      common case has no ragged tail tile at all.
    """
    gran = 8                                         # sublane granularity for block rows
    bytes_per_row = max(1, (hw_lanes + 128) * itemsize)   # input row + lane-padded output row
    tm = (per_buffer_bytes // bytes_per_row) // gran * gran
    tm = max(gran, tm)
    tm = min(tm, max(gran, _round_up(pl.cdiv(rows, 8), gran)))   # keep >= ~8 tiles
    tm = min(tm, _round_up(rows, gran))
    if rows % tm != 0:
        # prefer a nearby exact divisor (avoids the ragged boundary tile entirely)
        for cand in range(tm, max(gran, tm // 2) - 1, -gran):
            if rows % cand == 0:
                tm = cand
                break
    return tm


def gem_pallas(x, p, eps=1e-6):
    """x: (N, C, H, W) array, p: shape-(1,) trainable exponent. Returns (N, C, 1, 1)."""
    N, C, H, W = x.shape
    rows, hw = N * C, H * W
    itemsize = jnp.dtype(x.dtype).itemsize
    hw_lanes = pl.cdiv(hw, 128) * 128                # lane-padded width actually held in VMEM

    kind = _device_kind()
    is_v5 = "v5" in kind
    is_v6 = "v6" in kind
    if is_v6:
        per_buffer, vmem_cap = 14 << 20, 56 << 20    # 128 MiB physical VMEM: big tiles
    elif is_v5:
        per_buffer, vmem_cap = 7 << 20, 24 << 20     # stay clear of v5e scoped-VMEM pressure
    else:                                            # v7x (64 MiB physical / 32 MiB scoped) + unknown
        per_buffer, vmem_cap = 10 << 20, 30 << 20

    # bf16 EUP math only where the hardware has a bf16 VPU/EUP path (v6e/v7x).
    compute_dtype = jnp.float32
    if x.dtype == jnp.bfloat16 and not is_v5:
        compute_dtype = jnp.bfloat16

    tm = _pick_row_tile(rows, hw_lanes, itemsize, per_buffer)
    grid = (pl.cdiv(rows, tm),)                      # ragged tail (if any) handled by Pallas
    x2 = x.reshape(rows, hw)                         # glue reshape (no compute, no pad, no copy)

    # Scoped-VMEM budget with lane/sublane-padded tile sizes (double-buffered in + out).
    tm_pad = _round_up(tm, 16)
    tile_in_bytes = tm_pad * hw_lanes * itemsize
    tile_out_bytes = tm_pad * 128 * itemsize
    vmem_limit = 2 * (tile_in_bytes + tile_out_bytes) + (4 << 20)
    vmem_limit = int(max(8 << 20, min(vmem_cap, vmem_limit)))

    out = pl.pallas_call(
        functools.partial(_gem_kernel, eps=eps, hw=hw, compute_dtype=compute_dtype),
        out_shape=jax.ShapeDtypeStruct((rows, 1), x.dtype),
        grid=grid,
        in_specs=[
            pl.BlockSpec(memory_space=pltpu.MemorySpace.SMEM),   # p scalar, SMEM-resident
            pl.BlockSpec((tm, hw), lambda i: (i, 0)),            # row tile of x
        ],
        out_specs=pl.BlockSpec((tm, 1), lambda i: (i, 0)),
        compiler_params=pltpu.CompilerParams(
            dimension_semantics=("parallel",),                   # shard row tiles across TCs (v7x)
            vmem_limit_bytes=vmem_limit,
        ),
    )(jnp.asarray(p, jnp.float32).reshape(1), x2)

    return out.reshape(N, C, 1, 1)


def gem_reference(x, p, eps=1e-6):
    """Pure-JAX reference matching F.avg_pool2d(x.clamp(eps)^p, (H,W))^(1/p)."""
    p = jnp.asarray(p, jnp.float32).reshape(())
    xp = jnp.power(jnp.maximum(x.astype(jnp.float32), eps), p)
    m = jnp.mean(xp, axis=(-2, -1), keepdims=True)
    return jnp.power(m, 1.0 / p)


if __name__ == "__main__":
    key = jax.random.PRNGKey(0)
    N, C, H, W = 2, 4, 16, 16
    x = jax.random.normal(key, (N, C, H, W), dtype=jnp.float32)

    # GeM.__init__(p=3, p_trainable=True) -> Parameter(torch.ones(1) * 3)
    p = jnp.ones((1,), dtype=jnp.float32) * 3.0
    eps = 1e-6

    # f32 path
    out = jax.block_until_ready(gem_pallas(x, p, eps=eps))
    ref = gem_reference(x, p, eps=eps)
    assert out.shape == (N, C, 1, 1)
    assert jnp.allclose(out, ref, rtol=1e-4, atol=1e-5), (out, ref)

    # bf16 input path (half the HBM traffic; bf16 EUP math on v6e/v7x, f32 accumulation)
    xb = x.astype(jnp.bfloat16)
    outb = jax.block_until_ready(gem_pallas(xb, p, eps=eps))
    refb = gem_reference(xb, p, eps=eps)
    assert outb.shape == (N, C, 1, 1)
    assert jnp.allclose(outb.astype(jnp.float32), refb, rtol=3e-2, atol=3e-2), (outb, refb)

    # odd / lane-sparse shape: rows not a multiple of the tile, hw not a multiple of 128
    # (exercises the no-pad ragged-tail path; padded rows are independent and dropped)
    key2 = jax.random.PRNGKey(1)
    x_odd = jax.random.normal(key2, (3, 5, 7, 7), dtype=jnp.float32)
    out_odd = jax.block_until_ready(gem_pallas(x_odd, p, eps=eps))
    ref_odd = gem_reference(x_odd, p, eps=eps)
    assert out_odd.shape == (3, 5, 1, 1)
    assert jnp.allclose(out_odd, ref_odd, rtol=1e-4, atol=1e-5), (out_odd, ref_odd)

    print("KERNEL_OK")
</pallas_src>

<mosaic_0001>
module attributes {stable_mosaic.version = 11 : i64} {
  func.func @_gem_kernel(%arg0: i32, %arg1: memref<1xf32, #tpu.memory_space<smem>>, %arg2: memref<8x256xf32, #tpu.memory_space<vmem>>, %arg3: memref<8x1xf32, #tpu.memory_space<vmem>>) attributes {dimension_semantics = [#tpu.dimension_semantics<parallel>], iteration_bounds = array<i64: 1>, scalar_prefetch = 0 : i64, scratch_operands = 0 : i64, tpu.core_type = #tpu.core_type<tc>, window_params = [{transform_indices = @transform_0, window_bounds = array<i64: 1>}, {transform_indices = @transform_1, window_bounds = array<i64: 8, 256>}, {transform_indices = @transform_2, window_bounds = array<i64: 8, 1>}]} {
    %c0 = arith.constant 0 : index
    %0 = memref.load %arg1[%c0] : memref<1xf32, #tpu.memory_space<smem>>
    %cst = arith.constant 1.000000e+00 : f32
    %1 = arith.divf %cst, %0 : f32
    %c0_0 = arith.constant 0 : index
    %c0_1 = arith.constant 0 : index
    %2 = vector.load %arg2[%c0_0, %c0_1] : memref<8x256xf32, #tpu.memory_space<vmem>>, vector<8x256xf32>
    %cst_2 = arith.constant 9.99999997E-7 : f32
    %3 = vector.broadcast %cst_2 : f32 to vector<8x256xf32>
    %4 = arith.maximumf %2, %3 : vector<8x256xf32>
    %5 = math.log %4 : vector<8x256xf32>
    %6 = vector.broadcast %0 : f32 to vector<8x256xf32>
    %7 = arith.mulf %6, %5 : vector<8x256xf32>
    %8 = math.exp %7 : vector<8x256xf32>
    %cst_3 = arith.constant dense<0.000000e+00> : vector<8xf32>
    %9 = vector.multi_reduction <add>, %8, %cst_3 [1] : vector<8x256xf32> to vector<8xf32>
    %10 = vector.shape_cast %9 : vector<8xf32> to vector<8x1xf32>
    %cst_4 = arith.constant 3.906250e-03 : f32
    %11 = vector.broadcast %cst_4 : f32 to vector<8x1xf32>
    %12 = arith.mulf %10, %11 : vector<8x1xf32>
    %13 = math.log %12 : vector<8x1xf32>
    %14 = vector.broadcast %1 : f32 to vector<8x1xf32>
    %15 = arith.mulf %13, %14 : vector<8x1xf32>
    %16 = math.exp %15 : vector<8x1xf32>
    %c0_5 = arith.constant 0 : index
    %c0_6 = arith.constant 0 : index
    %17 = vector.load %arg3[%c0_5, %c0_6] : memref<8x1xf32, #tpu.memory_space<vmem>>, vector<8x1xf32>
    tpu.vector_store %arg3[%c0_5, %c0_6], %16 {strides = array<i32>} : memref<8x1xf32, #tpu.memory_space<vmem>>, vector<8x1xf32>,
    return
  }
  func.func @transform_0(%arg0: i32) -> i32 {
    %c0_i32 = arith.constant 0 : i32
    %c0_i32_0 = arith.constant 0 : i32
    return %c0_i32 : i32
  }
  func.func @transform_1(%arg0: i32) -> (i32, i32) {
    %c0_i32 = arith.constant 0 : i32
    %c0_i32_0 = arith.constant 0 : i32
    return %arg0, %c0_i32 : i32, i32
  }
  func.func @transform_2(%arg0: i32) -> (i32, i32) {
    %c0_i32 = arith.constant 0 : i32
    %c0_i32_0 = arith.constant 0 : i32
    return %arg0, %c0_i32 : i32, i32
  }
}

</mosaic_0001>

<bundles_post_ra>
// kernel: tpu_custom_call.1
= control target key start
LH: loop header
LB: loop body
LE: loop exit
PB: predicated region body
PF: predicated region fallthrough
CT: control target
= control target key end

     0   :  { %8 = vsyncpa [#allocation4], 0  ;;  %s101_s9 = smov [#allocation3]   ;;  %s135_s0 = inlined_call_operand.<no memory space> [shape: f32[1], index: 0, kind: input, shape index: {}]   ;;  %s136_s1 = inlined_call_operand.hbm [shape: f32[8,256], index: 1, kind: input, shape index: {}]   ;;  %s137_s2 = inlined_call_operand.vmem [shape: f32[8,1], index: 2, kind: output, shape index: {}]  }
   0x1   :  { %s17_s10 = sshll.u32 %s101_s9, 4  ;;  %s77_s13 = scalar_lea.hbm %s136_s1, 256  ;;  %s18_s10 = int_to_ptr.vmem [resolvable:$true] %s17_s10 }
   0x2   :  { %p78_p0 = scmp.ne.s32.totalorder %s136_s1, %s77_s13  ;;  %p81_p1 = scmp.lt.u32.totalorder %s77_s13, %s136_s1 }
   0x4   :  { %p83_p2 = pnand %p81_p1, %p78_p0 }
   0x6   :  { %86 = shalt.err (!%p83_p2)
}
   0x7   :  { %s87_s18 = scalar_lea.vmem %s18_s10, 256  ;;  %p92_p4 = scmp.lt.s32.totalorder %s18_s10, %s18_s10 }
   0x8   :  { %p88_p3 = scmp.ne.s32.totalorder %s18_s10, %s87_s18  ;;  %p93_p5 = scmp.lt.s32.totalorder %s87_s18, %s87_s18 }
   0xa   :  { %p94_p6 = por %p93_p5, %p92_p4 }
   0xc   :  { %p95_p7 = pnand %p94_p6, %p88_p3 }
   0xe   :  { %98 = shalt.err (!%p95_p7)
}
   0xf   :  { %20 = dma.hbm_to_vmem [thread:$0]  %s136_s1, 256, %s18_s10, [#allocation4]  }
  0x10   :  { %99 = dma.done.wait [#allocation4], 256  }
  0x11   :  { %100 = vsyncadd [#allocation4], 4294967040  ;;  %v25_v0 = vstv %s135_s0  ;;  %v28_v1 = vld [vmem:[#allocation3] sm:$0xff]  ;;  %v29_v2 = vld [vmem:[#allocation3 + $0x8] sm:$0xff]  ;;  %vm53_vm0 = vcmask 7168  }
  0x12   :  { %63 = vrcp.f32 %v25_v0  ;;  %v30_v3 = vmax.f32 %v28_v1, 1e-06  ;;  %v31_v4 = vmax.f32 %v29_v2, 1e-06 }
  0x14   :  { %65 = vlog2.f32 %v30_v3 }
  0x15   :  { %67 = vlog2.f32 %v31_v4 }
  0x1c   :  { %v64_v5 = vpop.eup %63 }
  0x1d   :  { %60 = vpush %v64_v5 }
  0x1e   :  { %v66_v6 = vpop.eup %65 }
  0x1f   :  { %v68_v7 = vpop.eup %67  ;;  %v33_v8 = vmul.f32 0.6931472, %v66_v6 }
  0x20   :  { %v35_v9 = vmul.f32 0.6931472, %v68_v7 }
  0x21   :  { %v37_v10 = vmul.f32 %v33_v8, %v25_v0 }
  0x22   :  { %v38_v11 = vmul.f32 %v35_v9, %v25_v0 }
  0x23   :  { %v39_v12 = vmul.f32 1.442695, %v37_v10 }
  0x24   :  { %v41_v13 = vmul.f32 1.442695, %v38_v11 }
  0x25   :  { %69 = vpow2.f32 %v39_v12 }
  0x26   :  { %71 = vpow2.f32 %v41_v13 }
  0x2f   :  { %v70_v14 = vpop.eup %69 }
  0x30   :  { %v72_v15 = vpop.eup %71 }
  0x31   :  { %v43_v16 = vadd.f32 %v72_v15, %v70_v14 }
  0x33   :  { %44 = vadd.xlane.f32.xlu0 %v43_v16 }
  0x4e   :  { %s61_s0 = spop %60 }
  0x4f   :  { %v49_v20 = vstv %s61_s0 }
  0xc0   :  { %v45_v17 = vpop.xlane.xlu0 %44 }
  0xc1   :  { %v46_v18 = vmul.f32 0.00390625, %v45_v17 }
  0xc3   :  { %73 = vlog2.f32 %v46_v18 }
  0xcd   :  { %v74_v19 = vpop.eup %73 }
  0xce   :  { %v48_v21 = vmul.f32 0.6931472, %v74_v19 }
  0xd0   :  { %v50_v22 = vmul.f32 %v49_v20, %v48_v21 }
  0xd2   :  { %v51_v23 = vmul.f32 1.442695, %v50_v22 }
  0xd4   :  { %75 = vpow2.f32 %v51_v23 }
  0xde   :  { %v76_v24 = vpop.eup %75 }
  0xdf   :  { %54 = vst.msk [vmem:[%s137_s2] sm:$0xff] %vm53_vm0, %v76_v24 }
  0xe0   :  { %59 = vsyncpa [#allocation4], 1 }

</bundles_post_ra>
